<compile_context>
chip_gen: v7x
topology: tpu7x:2x2x1
jax: 0.10.0
libtpu: 0.0.40
codegen_flags: <defaults>
</compile_context>

<pallas_src>
import functools

import jax
import jax.numpy as jnp
from jax import lax
from jax.experimental import pallas as pl
from jax.experimental.pallas import tpu as pltpu


def _attn_kernel(x_ref, wqkv_ref, bqkv_ref, wo_ref, bo_ref, o_ref, acc_ref,
                 *, bt, Lp, L, D, G, hd, scale):
    hg = pl.program_id(1)
    M = bt * Lp
    Gh = G * hd

    # Initialize the output accumulator with the (hoisted) output-projection
    # bias once per batch tile.
    @pl.when(hg == 0)
    def _():
        acc_ref[...] = jnp.broadcast_to(bo_ref[...], (M, D)).astype(jnp.float32)

    mxu_dt = x_ref.dtype
    # Leading-dim collapse; layout-free because Lp is a sublane-tile multiple.
    xm = x_ref[...].reshape(M, D)

    # One fused, wide projection per step: (M, D) @ (D, 3*G*hd) + fused bias.
    # Column layout of the slab: [q heads of group | k heads | v heads].
    qkv = jnp.dot(xm, wqkv_ref[0], preferred_element_type=jnp.float32) + bqkv_ref[0]

    if Lp != L:
        # Padded key positions must not receive any attention mass.
        key_valid = lax.broadcasted_iota(jnp.int32, (bt, Lp, Lp), 2) < L

    ctx_parts = []
    for g in range(G):                          # static unroll over the head group
        q = (qkv[:, g * hd:(g + 1) * hd] * scale).astype(mxu_dt).reshape(bt, Lp, hd)
        k = qkv[:, Gh + g * hd:Gh + (g + 1) * hd].astype(mxu_dt).reshape(bt, Lp, hd)
        v = qkv[:, 2 * Gh + g * hd:2 * Gh + (g + 1) * hd].astype(mxu_dt).reshape(bt, Lp, hd)

        # Batched scaled-dot-product attention over the batch tile (f32 softmax).
        s = jnp.einsum('bld,bmd->blm', q, k, preferred_element_type=jnp.float32)
        if Lp != L:
            s = jnp.where(key_valid, s, -jnp.inf)
        s = s - jnp.max(s, axis=-1, keepdims=True)
        p = jnp.exp(s)
        p = p * pl.reciprocal(jnp.sum(p, axis=-1, keepdims=True), approx=True)
        # TODO(synk): attention-prob dropout (training mode) omitted here.

        ctx_parts.append(
            jnp.einsum('blm,bmd->bld', p.astype(mxu_dt), v,
                       preferred_element_type=jnp.float32).reshape(M, hd))

    ctx = ctx_parts[0] if G == 1 else jnp.concatenate(ctx_parts, axis=-1)
    ctx = ctx.astype(mxu_dt)

    # One wide output-projection dot per step: (M, G*hd) @ (G*hd, D).
    acc_ref[...] += jnp.dot(ctx, wo_ref[0], preferred_element_type=jnp.float32)

    # With production D (multiple of 128) this store is lane-dense.
    @pl.when(hg == pl.num_programs(1) - 1)
    def _():
        o_ref[...] = acc_ref[...].reshape(bt, Lp, D).astype(o_ref.dtype)


def _vmem_limit_bytes():
    """~75% of physical VMEM (generation-aware); conservative 64 MiB fallback."""
    try:
        cap = pltpu.get_tpu_info().vmem_capacity_bytes
    except Exception:   # no TPU info available at trace time
        cap = 64 << 20  # v7x-sized fallback (most restrictive generation)
    return max(32 << 20, min(int(cap * 0.75), 100 << 20))


def _pick_head_group(H, hd, target=256):
    """Smallest divisor G of H with G*hd >= target MXU lanes (else G = H)."""
    for g in range(1, H + 1):
        if H % g == 0 and g * hd >= target:
            return g
    return H


def _pick_batch_tile(B, Lp, D, G, hd, op_bytes, out_bytes, budget):
    """Largest divisor of B whose per-step working set fits the VMEM budget,
    keeping >= 2 blocks on the parallel grid axis when B >= 2 (v7x: 2 TCs)."""
    def working_set(bt):
        M = bt * Lp
        ws = 2 * M * D * op_bytes              # x block, double-buffered
        ws += 2 * M * D * out_bytes            # out block, double-buffered
        ws += M * D * 4                        # f32 output accumulator (scratch)
        ws += M * 3 * G * hd * 4               # f32 fused qkv projection
        ws += 2 * bt * Lp * Lp * 4             # f32 scores + probs
        ws += M * G * hd * 4                   # f32 context staging
        ws += 2 * 4 * D * G * hd * op_bytes    # qkv + out weight slabs, double-buffered
        return ws

    candidates = [d for d in range(1, B + 1) if B % d == 0]
    if B >= 2:
        candidates = [d for d in candidates if B // d >= 2]
    best = 1
    for d in candidates:
        if working_set(d) <= budget:
            best = d
    return best


def simplified_attention(x, wqkv, bqkv, wo, bo, *, num_heads, mxu_dtype=None):
    """Eval-mode forward of SimplifiedAttention.

    x: (B, L, D); wqkv: (D, 3D) stored [in, out]; bqkv: (1, 3D);
    wo: (D, D) stored [in, out]; bo: (1, D).
    mxu_dtype: optional MXU operand dtype (use jnp.bfloat16 on v6e/v7x);
      softmax, biases and accumulation stay f32 regardless.
    """
    B, L, D = x.shape
    H = num_heads
    assert D % H == 0
    hd = D // H
    scale = hd ** (-0.5)
    out_dtype = x.dtype

    op_dtype = jnp.dtype(mxu_dtype) if mxu_dtype is not None else jnp.dtype(x.dtype)
    x = x.astype(op_dtype)
    wqkv = wqkv.astype(op_dtype)
    wo = wo.astype(op_dtype)
    bqkv = bqkv.astype(jnp.float32)   # biases stay f32 (added to f32 accumulators)
    bo = bo.astype(jnp.float32)

    # Pad L to the operand-dtype sublane tile so in-kernel reshapes are
    # layout-free; padded keys are masked inside the kernel.
    sublane = max(8, 32 // op_dtype.itemsize)
    Lp = ((L + sublane - 1) // sublane) * sublane
    if Lp != L:
        x = jnp.pad(x, ((0, 0), (0, Lp - L), (0, 0)))

    # --- head grouping + fused per-group parameter slabs (trace time) -------
    G = _pick_head_group(H, hd)
    n_groups = H // G
    Gh = G * hd

    wq, wk, wv = (wqkv[:, i * D:(i + 1) * D] for i in range(3))

    def group_w(w):                                    # (D, D) -> (n_groups, D, G*hd)
        return w.reshape(D, n_groups, Gh).transpose(1, 0, 2)

    wqkv_g = jnp.concatenate([group_w(wq), group_w(wk), group_w(wv)], axis=-1)
    bq, bk, bv = (bqkv[0, i * D:(i + 1) * D].reshape(n_groups, 1, Gh) for i in range(3))
    bqkv_g = jnp.concatenate([bq, bk, bv], axis=-1)    # (n_groups, 1, 3*G*hd)
    wo_g = wo.reshape(n_groups, Gh, D)                 # (n_groups, G*hd, D)

    # --- generation-aware VMEM budget, tiling, grid --------------------------
    vmem_limit = _vmem_limit_bytes()
    bt = _pick_batch_tile(B, Lp, D, G, hd, op_dtype.itemsize,
                          jnp.dtype(out_dtype).itemsize,
                          budget=int(vmem_limit * 0.8))
    grid = (B // bt, n_groups)                         # reduction (head-group) axis last

    kernel = functools.partial(_attn_kernel, bt=bt, Lp=Lp, L=L, D=D, G=G, hd=hd,
                               scale=scale)

    grid_spec = pltpu.PrefetchScalarGridSpec(
        num_scalar_prefetch=0,
        grid=grid,
        in_specs=[
            pl.BlockSpec((bt, Lp, D), lambda b, hg: (b, 0, 0)),        # x batch tile
            pl.BlockSpec((1, D, 3 * Gh), lambda b, hg: (hg, 0, 0)),    # fused qkv slab
            pl.BlockSpec((1, 1, 3 * Gh), lambda b, hg: (hg, 0, 0)),    # fused qkv bias
            pl.BlockSpec((1, Gh, D), lambda b, hg: (hg, 0, 0)),        # out-proj slab
            pl.BlockSpec((1, D), lambda b, hg: (0, 0)),                # out-proj bias
        ],
        out_specs=pl.BlockSpec((bt, Lp, D), lambda b, hg: (b, 0, 0)),
        scratch_shapes=[pltpu.VMEM((bt * Lp, D), jnp.float32)],        # output accumulator
    )

    out = pl.pallas_call(
        kernel,
        out_shape=jax.ShapeDtypeStruct((B, Lp, D), out_dtype),
        grid_spec=grid_spec,
        compiler_params=pltpu.CompilerParams(
            dimension_semantics=("parallel", "arbitrary"),
            vmem_limit_bytes=vmem_limit),
    )(x, wqkv_g, bqkv_g, wo_g, bo)

    if Lp != L:
        out = out[:, :L, :]
    return out


def _reference(x, wqkv, bqkv, wo, bo, *, num_heads):
    B, L, D = x.shape
    hd = D // num_heads
    qkv = jnp.einsum("bld,de->ble", x, wqkv) + bqkv[0]
    q, k, v = jnp.split(qkv, 3, axis=-1)

    def to_heads(t):
        return t.reshape(B, L, num_heads, hd).transpose(0, 2, 1, 3)

    q, k, v = map(to_heads, (q, k, v))
    attn = jnp.einsum("bhld,bhmd->bhlm", q, k) * (hd ** -0.5)
    attn = jax.nn.softmax(attn, axis=-1)
    ctx = jnp.einsum("bhlm,bhmd->bhld", attn, v)
    ctx = ctx.transpose(0, 2, 1, 3).reshape(B, L, D)
    return jnp.einsum("bld,de->ble", ctx, wo) + bo[0]


if __name__ == "__main__":
    B, L, D, H = 2, 8, 32, 4

    key = jax.random.PRNGKey(0)
    k_x, k_wqkv, k_bqkv, k_wo, k_bo = jax.random.split(key, 5)

    x = jax.random.normal(k_x, (B, L, D), dtype=jnp.float32)
    # Deterministic parameter init (PyTorch Linear shapes, stored as [in, out]).
    wqkv = jax.random.normal(k_wqkv, (D, 3 * D), dtype=jnp.float32) * (D ** -0.5)
    bqkv = jax.random.normal(k_bqkv, (1, 3 * D), dtype=jnp.float32) * 0.02
    wo = jax.random.normal(k_wo, (D, D), dtype=jnp.float32) * (D ** -0.5)
    bo = jax.random.normal(k_bo, (1, D), dtype=jnp.float32) * 0.02

    ref = _reference(x, wqkv, bqkv, wo, bo, num_heads=H)

    # f32-operand path.
    out = simplified_attention(x, wqkv, bqkv, wo, bo, num_heads=H)
    out = jax.block_until_ready(out)
    assert out.shape == (B, L, D)
    # Tolerance absorbs the EUP approximate reciprocal in the softmax denom;
    # structural errors would be O(1).
    assert jnp.allclose(out, ref, atol=1e-2, rtol=1e-2), float(
        jnp.max(jnp.abs(out - ref)))

    # bf16-operand path (v6e/v7x MXU rate); also exercises the L-padding /
    # key-masking path since L=8 < the bf16 sublane tile (16).  Loose
    # tolerance: bf16 operand rounding only, accumulation stays f32.
    out_bf16 = simplified_attention(x, wqkv, bqkv, wo, bo, num_heads=H,
                                    mxu_dtype=jnp.bfloat16)
    out_bf16 = jax.block_until_ready(out_bf16).astype(jnp.float32)
    assert out_bf16.shape == (B, L, D)
    assert jnp.allclose(out_bf16, ref, atol=0.25, rtol=0.1), float(
        jnp.max(jnp.abs(out_bf16 - ref)))

    print("KERNEL_OK")
</pallas_src>

<mosaic_0001>
module attributes {stable_mosaic.version = 11 : i64} {
  func.func @_attn_kernel(%arg0: i32, %arg1: i32, %arg2: memref<1x8x32xf32, #tpu.memory_space<vmem>>, %arg3: memref<1x32x96xf32, #tpu.memory_space<vmem>>, %arg4: memref<1x1x96xf32, #tpu.memory_space<vmem>>, %arg5: memref<1x32x32xf32, #tpu.memory_space<vmem>>, %arg6: memref<1x32xf32, #tpu.memory_space<vmem>>, %arg7: memref<1x8x32xf32, #tpu.memory_space<vmem>>, %arg8: memref<8x32xf32, #tpu.memory_space<vmem>>) attributes {dimension_semantics = [#tpu.dimension_semantics<parallel>, #tpu.dimension_semantics<arbitrary>], iteration_bounds = array<i64: 2, 1>, scalar_prefetch = 0 : i64, scratch_operands = 1 : i64, tpu.core_type = #tpu.core_type<tc>, window_params = [{transform_indices = @transform_0, window_bounds = array<i64: 1, 8, 32>}, {transform_indices = @transform_1, window_bounds = array<i64: 1, 32, 96>}, {transform_indices = @transform_2, window_bounds = array<i64: 1, 1, 96>}, {transform_indices = @transform_3, window_bounds = array<i64: 1, 32, 32>}, {pipeline_mode = #tpu.pipeline_mode<synchronous>, transform_indices = @transform_4, window_bounds = array<i64: 1, 32>}, {transform_indices = @transform_5, window_bounds = array<i64: 1, 8, 32>}]} {
    %c0_i32 = arith.constant 0 : i32
    %0 = arith.cmpi eq, %arg1, %c0_i32 : i32
    %1 = arith.extui %0 : i1 to i32
    %c0_i32_0 = arith.constant 0 : i32
    %2 = arith.cmpi ne, %1, %c0_i32_0 : i32
    scf.if %2 {
      %c0_39 = arith.constant 0 : index
      %c0_40 = arith.constant 0 : index
      %106 = vector.load %arg6[%c0_39, %c0_40] : memref<1x32xf32, #tpu.memory_space<vmem>>, vector<1x32xf32>
      %107 = vector.shape_cast %106 : vector<1x32xf32> to vector<1x32xf32>
      %108 = vector.broadcast %107 : vector<1x32xf32> to vector<8x32xf32>
      %c0_41 = arith.constant 0 : index
      %c0_42 = arith.constant 0 : index
      %109 = vector.load %arg8[%c0_41, %c0_42] : memref<8x32xf32, #tpu.memory_space<vmem>>, vector<8x32xf32>
      tpu.vector_store %arg8[%c0_41, %c0_42], %108 {strides = array<i32>} : memref<8x32xf32, #tpu.memory_space<vmem>>, vector<8x32xf32>,
    } else {
    }
    %c0 = arith.constant 0 : index
    %c0_1 = arith.constant 0 : index
    %c0_2 = arith.constant 0 : index
    %3 = vector.load %arg2[%c0, %c0_1, %c0_2] : memref<1x8x32xf32, #tpu.memory_space<vmem>>, vector<1x8x32xf32>
    %4 = vector.shape_cast %3 : vector<1x8x32xf32> to vector<8x32xf32>
    %c0_3 = arith.constant 0 : index
    %c0_4 = arith.constant 0 : index
    %c0_5 = arith.constant 0 : index
    %5 = vector.load %arg3[%c0_3, %c0_4, %c0_5] : memref<1x32x96xf32, #tpu.memory_space<vmem>>, vector<1x32x96xf32>
    %6 = vector.shape_cast %5 : vector<1x32x96xf32> to vector<32x96xf32>
    %cst = arith.constant dense<0.000000e+00> : vector<8x96xf32>
    %7 = tpu.matmul %4, %6, %cst {dimension_numbers = #tpu.dot_dimension_numbers<[1], [0], [0], [1], [0, 0, 1, 1], [], []>} : vector<8x32xf32>, vector<32x96xf32>, vector<8x96xf32> -> vector<8x96xf32>
    %c0_6 = arith.constant 0 : index
    %c0_7 = arith.constant 0 : index
    %c0_8 = arith.constant 0 : index
    %8 = vector.load %arg4[%c0_6, %c0_7, %c0_8] : memref<1x1x96xf32, #tpu.memory_space<vmem>>, vector<1x1x96xf32>
    %9 = vector.shape_cast %8 : vector<1x1x96xf32> to vector<1x96xf32>
    %10 = vector.broadcast %9 : vector<1x96xf32> to vector<8x96xf32>
    %11 = arith.addf %7, %10 : vector<8x96xf32>
    %12 = vector.extract_strided_slice %11 {offsets = [0, 0], sizes = [8, 8], strides = [1, 1]} : vector<8x96xf32> to vector<8x8xf32>
    %cst_9 = arith.constant 0.353553385 : f32
    %13 = vector.broadcast %cst_9 : f32 to vector<8x8xf32>
    %14 = arith.mulf %12, %13 : vector<8x8xf32>
    %15 = vector.shape_cast %14 : vector<8x8xf32> to vector<1x8x8xf32>
    %16 = vector.extract_strided_slice %11 {offsets = [0, 32], sizes = [8, 8], strides = [1, 1]} : vector<8x96xf32> to vector<8x8xf32>
    %17 = vector.shape_cast %16 : vector<8x8xf32> to vector<1x8x8xf32>
    %18 = vector.extract_strided_slice %11 {offsets = [0, 64], sizes = [8, 8], strides = [1, 1]} : vector<8x96xf32> to vector<8x8xf32>
    %19 = vector.shape_cast %18 : vector<8x8xf32> to vector<1x8x8xf32>
    "tpu.trace_start"() <{level = 10 : i32, message = "bld,bmd->blm"}> : () -> ()
    %cst_10 = arith.constant dense<0.000000e+00> : vector<1x8x8xf32>
    %20 = tpu.matmul %15, %17, %cst_10 {dimension_numbers = #tpu.dot_dimension_numbers<[2], [2], [1], [1], [0, 0, 0, 1, 1, 1], [0], [0]>} : vector<1x8x8xf32>, vector<1x8x8xf32>, vector<1x8x8xf32> -> vector<1x8x8xf32>
    "tpu.trace_stop"() : () -> ()
    %cst_11 = arith.constant dense<0xFF800000> : vector<1x8xf32>
    %21 = vector.multi_reduction <maximumf>, %20, %cst_11 [2] : vector<1x8x8xf32> to vector<1x8xf32>
    %22 = vector.shape_cast %21 : vector<1x8xf32> to vector<1x8x1xf32>
    %23 = vector.broadcast %22 : vector<1x8x1xf32> to vector<1x8x8xf32>
    %24 = arith.subf %20, %23 : vector<1x8x8xf32>
    %25 = math.exp %24 : vector<1x8x8xf32>
    %cst_12 = arith.constant dense<0.000000e+00> : vector<1x8xf32>
    %26 = vector.multi_reduction <add>, %25, %cst_12 [2] : vector<1x8x8xf32> to vector<1x8xf32>
    %27 = vector.shape_cast %26 : vector<1x8xf32> to vector<1x8x1xf32>
    %28 = tpu.reciprocal %27 {approx = true} : vector<1x8x1xf32> -> vector<1x8x1xf32>
    %29 = vector.broadcast %28 : vector<1x8x1xf32> to vector<1x8x8xf32>
    %30 = arith.mulf %25, %29 : vector<1x8x8xf32>
    "tpu.trace_start"() <{level = 10 : i32, message = "blm,bmd->bld"}> : () -> ()
    %cst_13 = arith.constant dense<0.000000e+00> : vector<1x8x8xf32>
    %31 = tpu.matmul %30, %19, %cst_13 {dimension_numbers = #tpu.dot_dimension_numbers<[2], [1], [1], [2], [0, 0, 0, 1, 1, 2], [0], [0]>} : vector<1x8x8xf32>, vector<1x8x8xf32>, vector<1x8x8xf32> -> vector<1x8x8xf32>
    "tpu.trace_stop"() : () -> ()
    %32 = vector.shape_cast %31 : vector<1x8x8xf32> to vector<8x8xf32>
    %33 = vector.extract_strided_slice %11 {offsets = [0, 8], sizes = [8, 8], strides = [1, 1]} : vector<8x96xf32> to vector<8x8xf32>
    %cst_14 = arith.constant 0.353553385 : f32
    %34 = vector.broadcast %cst_14 : f32 to vector<8x8xf32>
    %35 = arith.mulf %33, %34 : vector<8x8xf32>
    %36 = vector.shape_cast %35 : vector<8x8xf32> to vector<1x8x8xf32>
    %37 = vector.extract_strided_slice %11 {offsets = [0, 40], sizes = [8, 8], strides = [1, 1]} : vector<8x96xf32> to vector<8x8xf32>
    %38 = vector.shape_cast %37 : vector<8x8xf32> to vector<1x8x8xf32>
    %39 = vector.extract_strided_slice %11 {offsets = [0, 72], sizes = [8, 8], strides = [1, 1]} : vector<8x96xf32> to vector<8x8xf32>
    %40 = vector.shape_cast %39 : vector<8x8xf32> to vector<1x8x8xf32>
    "tpu.trace_start"() <{level = 10 : i32, message = "bld,bmd->blm"}> : () -> ()
    %cst_15 = arith.constant dense<0.000000e+00> : vector<1x8x8xf32>
    %41 = tpu.matmul %36, %38, %cst_15 {dimension_numbers = #tpu.dot_dimension_numbers<[2], [2], [1], [1], [0, 0, 0, 1, 1, 1], [0], [0]>} : vector<1x8x8xf32>, vector<1x8x8xf32>, vector<1x8x8xf32> -> vector<1x8x8xf32>
    "tpu.trace_stop"() : () -> ()
    %cst_16 = arith.constant dense<0xFF800000> : vector<1x8xf32>
    %42 = vector.multi_reduction <maximumf>, %41, %cst_16 [2] : vector<1x8x8xf32> to vector<1x8xf32>
    %43 = vector.shape_cast %42 : vector<1x8xf32> to vector<1x8x1xf32>
    %44 = vector.broadcast %43 : vector<1x8x1xf32> to vector<1x8x8xf32>
    %45 = arith.subf %41, %44 : vector<1x8x8xf32>
    %46 = math.exp %45 : vector<1x8x8xf32>
    %cst_17 = arith.constant dense<0.000000e+00> : vector<1x8xf32>
    %47 = vector.multi_reduction <add>, %46, %cst_17 [2] : vector<1x8x8xf32> to vector<1x8xf32>
    %48 = vector.shape_cast %47 : vector<1x8xf32> to vector<1x8x1xf32>
    %49 = tpu.reciprocal %48 {approx = true} : vector<1x8x1xf32> -> vector<1x8x1xf32>
    %50 = vector.broadcast %49 : vector<1x8x1xf32> to vector<1x8x8xf32>
    %51 = arith.mulf %46, %50 : vector<1x8x8xf32>
    "tpu.trace_start"() <{level = 10 : i32, message = "blm,bmd->bld"}> : () -> ()
    %cst_18 = arith.constant dense<0.000000e+00> : vector<1x8x8xf32>
    %52 = tpu.matmul %51, %40, %cst_18 {dimension_numbers = #tpu.dot_dimension_numbers<[2], [1], [1], [2], [0, 0, 0, 1, 1, 2], [0], [0]>} : vector<1x8x8xf32>, vector<1x8x8xf32>, vector<1x8x8xf32> -> vector<1x8x8xf32>
    "tpu.trace_stop"() : () -> ()
    %53 = vector.shape_cast %52 : vector<1x8x8xf32> to vector<8x8xf32>
    %54 = vector.extract_strided_slice %11 {offsets = [0, 16], sizes = [8, 8], strides = [1, 1]} : vector<8x96xf32> to vector<8x8xf32>
    %cst_19 = arith.constant 0.353553385 : f32
    %55 = vector.broadcast %cst_19 : f32 to vector<8x8xf32>
    %56 = arith.mulf %54, %55 : vector<8x8xf32>
    %57 = vector.shape_cast %56 : vector<8x8xf32> to vector<1x8x8xf32>
    %58 = vector.extract_strided_slice %11 {offsets = [0, 48], sizes = [8, 8], strides = [1, 1]} : vector<8x96xf32> to vector<8x8xf32>
    %59 = vector.shape_cast %58 : vector<8x8xf32> to vector<1x8x8xf32>
    %60 = vector.extract_strided_slice %11 {offsets = [0, 80], sizes = [8, 8], strides = [1, 1]} : vector<8x96xf32> to vector<8x8xf32>
    %61 = vector.shape_cast %60 : vector<8x8xf32> to vector<1x8x8xf32>
    "tpu.trace_start"() <{level = 10 : i32, message = "bld,bmd->blm"}> : () -> ()
    %cst_20 = arith.constant dense<0.000000e+00> : vector<1x8x8xf32>
    %62 = tpu.matmul %57, %59, %cst_20 {dimension_numbers = #tpu.dot_dimension_numbers<[2], [2], [1], [1], [0, 0, 0, 1, 1, 1], [0], [0]>} : vector<1x8x8xf32>, vector<1x8x8xf32>, vector<1x8x8xf32> -> vector<1x8x8xf32>
    "tpu.trace_stop"() : () -> ()
    %cst_21 = arith.constant dense<0xFF800000> : vector<1x8xf32>
    %63 = vector.multi_reduction <maximumf>, %62, %cst_21 [2] : vector<1x8x8xf32> to vector<1x8xf32>
    %64 = vector.shape_cast %63 : vector<1x8xf32> to vector<1x8x1xf32>
    %65 = vector.broadcast %64 : vector<1x8x1xf32> to vector<1x8x8xf32>
    %66 = arith.subf %62, %65 : vector<1x8x8xf32>
    %67 = math.exp %66 : vector<1x8x8xf32>
    %cst_22 = arith.constant dense<0.000000e+00> : vector<1x8xf32>
    %68 = vector.multi_reduction <add>, %67, %cst_22 [2] : vector<1x8x8xf32> to vector<1x8xf32>
    %69 = vector.shape_cast %68 : vector<1x8xf32> to vector<1x8x1xf32>
    %70 = tpu.reciprocal %69 {approx = true} : vector<1x8x1xf32> -> vector<1x8x1xf32>
    %71 = vector.broadcast %70 : vector<1x8x1xf32> to vector<1x8x8xf32>
    %72 = arith.mulf %67, %71 : vector<1x8x8xf32>
    "tpu.trace_start"() <{level = 10 : i32, message = "blm,bmd->bld"}> : () -> ()
    %cst_23 = arith.constant dense<0.000000e+00> : vector<1x8x8xf32>
    %73 = tpu.matmul %72, %61, %cst_23 {dimension_numbers = #tpu.dot_dimension_numbers<[2], [1], [1], [2], [0, 0, 0, 1, 1, 2], [0], [0]>} : vector<1x8x8xf32>, vector<1x8x8xf32>, vector<1x8x8xf32> -> vector<1x8x8xf32>
    "tpu.trace_stop"() : () -> ()
    %74 = vector.shape_cast %73 : vector<1x8x8xf32> to vector<8x8xf32>
    %75 = vector.extract_strided_slice %11 {offsets = [0, 24], sizes = [8, 8], strides = [1, 1]} : vector<8x96xf32> to vector<8x8xf32>
    %cst_24 = arith.constant 0.353553385 : f32
    %76 = vector.broadcast %cst_24 : f32 to vector<8x8xf32>
    %77 = arith.mulf %75, %76 : vector<8x8xf32>
    %78 = vector.shape_cast %77 : vector<8x8xf32> to vector<1x8x8xf32>
    %79 = vector.extract_strided_slice %11 {offsets = [0, 56], sizes = [8, 8], strides = [1, 1]} : vector<8x96xf32> to vector<8x8xf32>
    %80 = vector.shape_cast %79 : vector<8x8xf32> to vector<1x8x8xf32>
    %81 = vector.extract_strided_slice %11 {offsets = [0, 88], sizes = [8, 8], strides = [1, 1]} : vector<8x96xf32> to vector<8x8xf32>
    %82 = vector.shape_cast %81 : vector<8x8xf32> to vector<1x8x8xf32>
    "tpu.trace_start"() <{level = 10 : i32, message = "bld,bmd->blm"}> : () -> ()
    %cst_25 = arith.constant dense<0.000000e+00> : vector<1x8x8xf32>
    %83 = tpu.matmul %78, %80, %cst_25 {dimension_numbers = #tpu.dot_dimension_numbers<[2], [2], [1], [1], [0, 0, 0, 1, 1, 1], [0], [0]>} : vector<1x8x8xf32>, vector<1x8x8xf32>, vector<1x8x8xf32> -> vector<1x8x8xf32>
    "tpu.trace_stop"() : () -> ()
    %cst_26 = arith.constant dense<0xFF800000> : vector<1x8xf32>
    %84 = vector.multi_reduction <maximumf>, %83, %cst_26 [2] : vector<1x8x8xf32> to vector<1x8xf32>
    %85 = vector.shape_cast %84 : vector<1x8xf32> to vector<1x8x1xf32>
    %86 = vector.broadcast %85 : vector<1x8x1xf32> to vector<1x8x8xf32>
    %87 = arith.subf %83, %86 : vector<1x8x8xf32>
    %88 = math.exp %87 : vector<1x8x8xf32>
    %cst_27 = arith.constant dense<0.000000e+00> : vector<1x8xf32>
    %89 = vector.multi_reduction <add>, %88, %cst_27 [2] : vector<1x8x8xf32> to vector<1x8xf32>
    %90 = vector.shape_cast %89 : vector<1x8xf32> to vector<1x8x1xf32>
    %91 = tpu.reciprocal %90 {approx = true} : vector<1x8x1xf32> -> vector<1x8x1xf32>
    %92 = vector.broadcast %91 : vector<1x8x1xf32> to vector<1x8x8xf32>
    %93 = arith.mulf %88, %92 : vector<1x8x8xf32>
    "tpu.trace_start"() <{level = 10 : i32, message = "blm,bmd->bld"}> : () -> ()
    %cst_28 = arith.constant dense<0.000000e+00> : vector<1x8x8xf32>
    %94 = tpu.matmul %93, %82, %cst_28 {dimension_numbers = #tpu.dot_dimension_numbers<[2], [1], [1], [2], [0, 0, 0, 1, 1, 2], [0], [0]>} : vector<1x8x8xf32>, vector<1x8x8xf32>, vector<1x8x8xf32> -> vector<1x8x8xf32>
    "tpu.trace_stop"() : () -> ()
    %95 = vector.shape_cast %94 : vector<1x8x8xf32> to vector<8x8xf32>
    %96 = tpu.concatenate %32, %53, %74, %95 in 1 : vector<8x8xf32>, vector<8x8xf32>, vector<8x8xf32>, vector<8x8xf32> -> vector<8x32xf32>
    %c0_29 = arith.constant 0 : index
    %c0_30 = arith.constant 0 : index
    %97 = vector.load %arg8[%c0_29, %c0_30] : memref<8x32xf32, #tpu.memory_space<vmem>>, vector<8x32xf32>
    %c0_31 = arith.constant 0 : index
    %c0_32 = arith.constant 0 : index
    %c0_33 = arith.constant 0 : index
    %98 = vector.load %arg5[%c0_31, %c0_32, %c0_33] : memref<1x32x32xf32, #tpu.memory_space<vmem>>, vector<1x32x32xf32>
    %99 = vector.shape_cast %98 : vector<1x32x32xf32> to vector<32x32xf32>
    %cst_34 = arith.constant dense<0.000000e+00> : vector<8x32xf32>
    %100 = tpu.matmul %96, %99, %cst_34 {dimension_numbers = #tpu.dot_dimension_numbers<[1], [0], [0], [1], [0, 0, 1, 1], [], []>} : vector<8x32xf32>, vector<32x32xf32>, vector<8x32xf32> -> vector<8x32xf32>
    %101 = arith.addf %97, %100 : vector<8x32xf32>
    %c0_35 = arith.constant 0 : index
    %c0_36 = arith.constant 0 : index
    %102 = vector.load %arg8[%c0_35, %c0_36] : memref<8x32xf32, #tpu.memory_space<vmem>>, vector<8x32xf32>
    tpu.vector_store %arg8[%c0_35, %c0_36], %101 {strides = array<i32>} : memref<8x32xf32, #tpu.memory_space<vmem>>, vector<8x32xf32>,
    %c0_i32_37 = arith.constant 0 : i32
    %103 = arith.cmpi eq, %arg1, %c0_i32_37 : i32
    %104 = arith.extui %103 : i1 to i32
    %c0_i32_38 = arith.constant 0 : i32
    %105 = arith.cmpi ne, %104, %c0_i32_38 : i32
    scf.if %105 {
      %c0_39 = arith.constant 0 : index
      %c0_40 = arith.constant 0 : index
      %106 = vector.load %arg8[%c0_39, %c0_40] : memref<8x32xf32, #tpu.memory_space<vmem>>, vector<8x32xf32>
      %107 = vector.shape_cast %106 : vector<8x32xf32> to vector<1x8x32xf32>
      %c0_41 = arith.constant 0 : index
      %c0_42 = arith.constant 0 : index
      %c0_43 = arith.constant 0 : index
      %108 = vector.load %arg7[%c0_41, %c0_42, %c0_43] : memref<1x8x32xf32, #tpu.memory_space<vmem>>, vector<1x8x32xf32>
      tpu.vector_store %arg7[%c0_41, %c0_42, %c0_43], %107 {strides = array<i32>} : memref<1x8x32xf32, #tpu.memory_space<vmem>>, vector<1x8x32xf32>,
    } else {
    }
    return
  }
  func.func @transform_0(%arg0: i32, %arg1: i32) -> (i32, i32, i32) {
    %c0_i32 = arith.constant 0 : i32
    %c0_i32_0 = arith.constant 0 : i32
    %c0_i32_1 = arith.constant 0 : i32
    return %arg0, %c0_i32, %c0_i32_0 : i32, i32, i32
  }
  func.func @transform_1(%arg0: i32, %arg1: i32) -> (i32, i32, i32) {
    %c0_i32 = arith.constant 0 : i32
    %c0_i32_0 = arith.constant 0 : i32
    %c0_i32_1 = arith.constant 0 : i32
    return %arg1, %c0_i32, %c0_i32_0 : i32, i32, i32
  }
  func.func @transform_2(%arg0: i32, %arg1: i32) -> (i32, i32, i32) {
    %c0_i32 = arith.constant 0 : i32
    %c0_i32_0 = arith.constant 0 : i32
    %c0_i32_1 = arith.constant 0 : i32
    return %arg1, %c0_i32, %c0_i32_0 : i32, i32, i32
  }
  func.func @transform_3(%arg0: i32, %arg1: i32) -> (i32, i32, i32) {
    %c0_i32 = arith.constant 0 : i32
    %c0_i32_0 = arith.constant 0 : i32
    %c0_i32_1 = arith.constant 0 : i32
    return %arg1, %c0_i32, %c0_i32_0 : i32, i32, i32
  }
  func.func @transform_4(%arg0: i32, %arg1: i32) -> (i32, i32) {
    %c0_i32 = arith.constant 0 : i32
    %c0_i32_0 = arith.constant 0 : i32
    %c0_i32_1 = arith.constant 0 : i32
    return %c0_i32, %c0_i32_0 : i32, i32
  }
  func.func @transform_5(%arg0: i32, %arg1: i32) -> (i32, i32, i32) {
    %c0_i32 = arith.constant 0 : i32
    %c0_i32_0 = arith.constant 0 : i32
    %c0_i32_1 = arith.constant 0 : i32
    return %arg0, %c0_i32, %c0_i32_0 : i32, i32, i32
  }
}

</mosaic_0001>

<bundles_post_ra>
// kernel: tpu_custom_call.1
= control target key start
LH: loop header
LB: loop body
LE: loop exit
PB: predicated region body
PF: predicated region fallthrough
CT: control target
= control target key end

     0   :  { %10 = vsyncpa [#allocation4], 0  ;;  %s2112_s0 = inlined_call_operand.hbm [shape: f32[2,8,32], index: 0, kind: input, shape index: {}]   ;;  %s2113_s1 = inlined_call_operand.hbm [shape: f32[1,32,96], index: 1, kind: input, shape index: {}]   ;;  %s2114_s2 = inlined_call_operand.vmem [shape: f32[1,1,96], index: 2, kind: input, shape index: {}]   ;;  %s2115_s3 = inlined_call_operand.hbm [shape: f32[1,32,32], index: 3, kind: input, shape index: {}]   ;;  %s2116_s4 = inlined_call_operand.vmem [shape: f32[1,32], index: 4, kind: input, shape index: {}]   ;;  %s2117_s5 = inlined_call_operand.hbm [shape: f32[2,8,32], index: 5, kind: output, shape index: {}]  }
   0x1   :  { %12 = vsyncpa [#allocation4 + $0x1], 0 }
   0x2   :  { %13 = vsyncpa [#allocation7], 0 }
   0x3   :  { %14 = vsyncpa [#allocation5], 0 }
   0x4   :  { %16 = vsyncpa [#allocation5 + $0x1], 0  ;;  %s1780_s18 = smov 0   ;;  %s1782_s19 = smov 0  }
   0x5   :  { %s1784_s20 = smov 0   ;;  %s1786_s21 = smov 0  }
   0x6   :  { %s1788_s22 = smov 0   ;;  %s1790_s23 = smov 0  }
   0x7 LB: > { %s1301_s24 = sadd.s32 4294967295, %s1725_s23   ;;  %s1302_s25 = sadd.s32 4294967294, %s1725_s23   ;;  %s1725_s23 = sphi %s1790_s23, %s22_s23   ;;  %s1721_s22 = sphi %s1788_s22, %s2139_s22   ;;  %s1717_s21 = sphi %s1786_s21, %s2138_s21   ;;  %s1713_s20 = sphi %s1784_s20, %s2137_s20   ;;  %s1709_s19 = sphi %s1782_s19, %s2136_s19   ;;  %s1705_s18 = sphi %s1780_s18, %s2135_s18  }
   0x8   : > { %p54_p0 = scmp.ne.s32.totalorder %s1709_s19, %s1705_s18  ;;  %p1814_p1 = scmp.eq.s32.totalorder %s1301_s24, 0 }
   0x9   : > { %p1818_p2 = scmp.eq.s32.totalorder %s1301_s24, 1  ;;  %p183_p3 = scmp.eq.s32.totalorder %s1302_s25, 1 }
   0xa   : > { %s2122_s26 = scalar_select %p1814_p1, 1, 0 }
   0xb   : > { %p1824_p4 = por %p1814_p1, %p54_p0  ;;  %p1303_p5 = scmp.ge.s32.totalorder %s1725_s23, 1 }
   0xc   : > { %p1829_p6 = por %p183_p3, %p54_p0  ;;  %p190_p7 = scmp.lt.s32.totalorder %s1725_s23, 3 }
   0xd   : > { %s2124_s28 = scalar_select %p1824_p4, 1, 0 }
   0xe   : > { %s2125_s29 = scalar_select %p1829_p6, 1, 0 }
   0xf   : > { %p1834_p8 = pnand %p1303_p5, %p190_p7  ;;  %s1727_s6 = smov [#allocation6]  }
  0x10   : > { %s205_s7 = sshll.u32 %s1727_s6, 4  ;;  %s1728_s9 = smov [#allocation8]   ;;  %s1838_s7 = int_to_ptr.vmem [resolvable:$true] %s205_s7 }
  0x11   : > { %p1447_p9 = pneg %p1834_p8  ;;  %s227_s10 = sshll.u32 %s1728_s9, 4  ;;  %s1849_s10 = int_to_ptr.vmem [resolvable:$true] %s227_s10 }
  0x12   : > { %s1553_s13 = scalar_lea.hbm %s2113_s1, 512 }
  0x13   : > { %p1845_p11 = pnand %p1447_p9, %p1814_p1  ;;  %p1554_p12 = scmp.ne.s32.totalorder %s2113_s1, %s1553_s13 }
  0x14   : > { %p1560_p5 = scmp.lt.u32.totalorder %s1553_s13, %s2113_s1 }
  0x15   : > { %p1555_p13 = pneg %p1845_p11 }
  0x17   : > { %p1556_p0 = pnand %p1555_p13, %p1554_p12 }
  0x19   : > { %p1557_p3 = pneg %p1556_p0 }
  0x1b   : > { %p1562_p7 = pnand %p1560_p5, %p1557_p3 }
  0x1d   : > { %1565 = shalt.err (!%p1562_p7)
}
  0x1e   : > { %s1566_s24 = scalar_lea.vmem %s1838_s7, 512  ;;  %p1574_p1 = scmp.lt.s32.totalorder %s1838_s7, %s1838_s7 }
  0x1f   : > { %p1567_p9 = scmp.ne.s32.totalorder %s1838_s7, %s1566_s24  ;;  %p1575_p12 = scmp.lt.s32.totalorder %s1566_s24, %s1566_s24 }
  0x21   : > { %p1569_p10 = pnand %p1567_p9, %p1555_p13  ;;  %p1576_p0 = por %p1575_p12, %p1574_p1 }
  0x23   : > { %p1570_p6 = pneg %p1569_p10 }
  0x25   : > { %p1577_p4 = pnand %p1576_p0, %p1570_p6 }
  0x27   : > { %1580 = shalt.err (!%p1577_p4)
}
  0x28   : > { %s1729_s25 = smov 128   ;;  %s1730_s6 = smov 8  }
  0x29   : > { %1450 = dma.hbm_to_vmem [thread:$0]  (!%p1845_p11), %s2113_s1, 512, %s1838_s7, [#allocation7], %s1729_s25, %s1729_s25, %s1730_s6  }
  0x2a   : > { %s1581_s14 = scalar_lea.hbm %s2115_s3, 512 }
  0x2b   : > { %p1582_p1 = scmp.ne.s32.totalorder %s2115_s3, %s1581_s14  ;;  %p1588_p10 = scmp.lt.u32.totalorder %s1581_s14, %s2115_s3 }
  0x2d   : > { %p1584_p4 = pnand %p1582_p1, %p1555_p13 }
  0x2f   : > { %p1585_p6 = pneg %p1584_p4 }
  0x31   : > { %p1590_p3 = pnand %p1588_p10, %p1585_p6 }
  0x33   : > { %1593 = shalt.err (!%p1590_p3)
}
  0x34   : > { %s1594_s7 = scalar_lea.vmem %s1849_s10, 512  ;;  %p1602_p12 = scmp.lt.s32.totalorder %s1849_s10, %s1849_s10 }
  0x35   : > { %p1595_p5 = scmp.ne.s32.totalorder %s1849_s10, %s1594_s7  ;;  %p1603_p0 = scmp.lt.s32.totalorder %s1594_s7, %s1594_s7 }
  0x37   : > { %p1597_p7 = pnand %p1595_p5, %p1555_p13  ;;  %p1604_p1 = por %p1603_p0, %p1602_p12 }
  0x39   : > { %p1598_p9 = pneg %p1597_p7 }
  0x3b   : > { %p1605_p4 = pnand %p1604_p1, %p1598_p9 }
  0x3d   : > { %1608 = shalt.err (!%p1605_p4)
}
  0x3e   : > { %1453 = dma.hbm_to_vmem [thread:$0]  (!%p1845_p11), %s2115_s3, 512, %s1849_s10, [#allocation7], %s1729_s25, %s1729_s25, %s1730_s6  }
  0x3f   : > { %s34_s12 = sadd.s32 1, %s1721_s22  ;;  %s41_s13 = sadd.s32 1, %s1713_s20 }
  0x40   : > { %p36_p13 = scmp.ge.s32.totalorder %s34_s12, 2  ;;  %p48_p6 = scmp.ne.s32.totalorder %s1713_s20, %s1709_s19 }
  0x41   : > { %p49_p10 = scmp.eq.s32.totalorder %s1725_s23, 0  ;;  %p1464_p3 = scmp.lt.s32.totalorder %s1725_s23, 2 }
  0x42   : > { %s2141_s12 = smov (%p36_p13, %s34_s12), 0  ;;  %p1913_p7 = por %p1818_p2, %p48_p6 }
  0x43   : > { %p50_p5 = por %p49_p10, %p48_p6  ;;  %s38_s14 = ssub.s32 %s1721_s22, %s2141_s12 }
  0x44   : > { %s2128_s8 = scalar_select %p1913_p7, 1, 0 }
  0x45   : > { %s244_s15 = sand.u32 1, %s1713_s20   ;;  %p39_p9 = scmp.eq.s32.totalorder %s38_s14, 0 }
  0x46   : > { %s1308_s10 = sshll.u32 %s244_s15, 3  ;;  %s1309_s25 = sshll.u32 %s1721_s22, 7 }
  0x47   : > { %s1922_s6 = scalar_select %p39_p9, %s1713_s20, %s41_s13  }
  0x48   : > { %s1927_s24 = scalar_lea.hbm %s2112_s0, %s1309_s25  ;;  %s248_s27 = scalar_lea.vmem [#allocation3], %s1308_s10 }
  0x49   : > { %s255_s7 = sshll.u32 %s248_s27, 4  ;;  %p1931_p2 = pnand %p1464_p3, %p50_p5  ;;  %s1935_s7 = int_to_ptr.vmem [resolvable:$true] %s255_s7 }
  0x4a   : > { %s245_s11 = scalar_lea.sflag [#allocation4], %s244_s15  ;;  %s1609_s13 = scalar_lea.hbm %s1927_s24, 128 }
  0x4b   : > { %p1610_p11 = scmp.ne.s32.totalorder %s1927_s24, %s1609_s13  ;;  %p1611_p12 = pneg %p1931_p2 }
  0x4c   : > { %s1614_s25 = scalar_lea.hbm %s2112_s0, 256  ;;  %p1615_p4 = scmp.lt.u32.totalorder %s1927_s24, %s2112_s0 }
  0x4d   : > { %p1612_p0 = pnand %p1611_p12, %p1610_p11  ;;  %p1616_p13 = scmp.lt.u32.totalorder %s1614_s25, %s1609_s13 }
  0x4e   : > { %p1618_p10 = scmp.lt.u32.totalorder %s1609_s13, %s1927_s24 }
  0x4f   : > { %p1613_p1 = pneg %p1612_p0  ;;  %p1617_p6 = por %p1616_p13, %p1615_p4 }
  0x51   : > { %p1619_p3 = por %p1618_p10, %p1617_p6 }
  0x53   : > { %p1620_p5 = pnand %p1619_p3, %p1613_p1 }
  0x55   : > { %1623 = shalt.err (!%p1620_p5)
}
  0x56   : > { %s1624_s15 = scalar_lea.vmem %s1935_s7, 128  ;;  %s1731_s27 = smov [#allocation3]  }
  0x57   : > { %p1625_p9 = scmp.ne.s32.totalorder %s1935_s7, %s1624_s15  ;;  %s1629_s14 = sshll.u32 %s1731_s27, 4  ;;  %s1630_s14 = int_to_ptr.vmem [resolvable:$false] %s1629_s14 }
  0x58   : > { %s1631_s10 = scalar_lea.vmem %s1630_s14, 256  ;;  %p1632_p7 = scmp.lt.s32.totalorder %s1935_s7, %s1630_s14 }
  0x59   : > { %p1627_p11 = pnand %p1625_p9, %p1611_p12  ;;  %p1633_p4 = scmp.lt.s32.totalorder %s1631_s10, %s1624_s15 }
  0x5b   : > { %p1628_p0 = pneg %p1627_p11  ;;  %p1634_p13 = por %p1633_p4, %p1632_p7 }
  0x5d   : > { %p1635_p6 = pnand %p1634_p13, %p1628_p0 }
  0x5f   : > { %1638 = shalt.err (!%p1635_p6)
}
  0x60   : > { %1457 = dma.hbm_to_vmem [thread:$0]  (!%p1931_p2), %s1927_s24, 128, %s1935_s7, %s245_s11  }
  0x61   : > { %264 = sbr.rel (%p1834_p8) target bundleno = 2119 (0x847), region = 40  ;;  %s1965_s13 = sand.u32 (!%p1834_p8), 1, %s1709_s19  }
  0x62   : > { %s1311_s25 = sshll.u32 (!%p1834_p8), %s1965_s13, 3  ;;  %s267_s16 = scalar_lea.sflag (!%p1834_p8), [#allocation4], %s1965_s13 }
  0x63   : > { %s270_s17 = scalar_lea.vmem (!%p1834_p8), [#allocation3], %s1311_s25  ;;  %p2130_p7 = scmp.ne.s32.totalorder (!%p1834_p8), %s2124_s28, 0 }
  0x68   : > { %1692 = dma.done.wait (%p2130_p7), %s267_s16, 128  }
  0x69   : > { %1694 = vsyncadd (%p2130_p7), %s267_s16, 4294967168  ;;  %p2131_p2 = scmp.ne.s32.totalorder %s2122_s26, 0 }
  0x6b   : > { %1696 = dma.done.wait (%p2131_p2), [#allocation7], 1024  }
  0x6c   : > { %1698 = vsyncadd (%p2131_p2), [#allocation7], 4294966272  ;;  %v1732_v0 = vmov 0.0|0.0   ;;  %vm1733_vm0 = vmmov 0   ;;  %v1734_v1 = vmov 0.0   ;;  %v325_v2 = vld [vmem:[#allocation6] sm:$0xff] }
  0x6d   : > { %1423 = vmatprep.subr.bf16.mxu0 %v1732_v0  ;;  %1369 = vmatprep.mubr.msk.f32.mxu0 %vm1733_vm0, %v1734_v1  ;;  %v326_v3 = vld [vmem:[#allocation6 + $0x8] sm:$0xff]  ;;  %v327_v4 = vld [vmem:[#allocation6 + $0x10] sm:$0xff]  ;;  %v328_v6 = vld [vmem:[#allocation6 + $0x18] sm:$0xff]  ;;  %vm322_vm1 = vcmask 261120   ;;  %s1735_s7 = smov 64   ;;  %s1736_s9 = smov 96  }
  0x6e   : > { %1372 = vmatprep.subr.mxu1 %v1734_v1  ;;  %1374 = vmatprep.mubr.msk.f32.mxu1 %vm1733_vm0, %v1734_v1  ;;  %v1424_v5 = vpack.c.bf16 %v326_v3, %v325_v2  ;;  %v1315_v7 = vld [vmem:[%s2116_s4] ss:$0 sm:$0xff]  ;;  %v1427_v8 = vpack.c.bf16 %v328_v6, %v327_v4  ;;  %v324_v9 = vld [vmem:[%s270_s17] sm:$0xff]  ;;  %s1737_s11 = smov 88   ;;  %s1738_s15 = smov 120   ;;  %vm414_vm2 = vcmask 64512  }
  0x6f   : > { %323 = vst.msk [vmem:[#allocation2] sm:$0xff] %vm322_vm1, %v1315_v7  ;;  %v1316_v10 = vld [vmem:[%s2114_s2] ss:$0 sm:$0xff]  ;;  %s1739_s27 = smov 80   ;;  %s1740_s14 = smov 72   ;;  %vm1085_vm3 = vcmask 130048  }
  0x70   : > { %1425 = vmatpush3.bf16.msra.mxu0 %v1424_v5  ;;  %s1741_s10 = smov 112   ;;  %s1742_s16 = smov 104   ;;  %vm1087_vm4 = vcmask 195584  }
  0x71   : > { %1426 = vmatprep.subr.bf16.mxu0 %v1732_v0  ;;  %s1743_s17 = smov 56   ;;  %s1744_s26 = smov 48  }
  0x72   : > { %s1745_s28 = smov 40   ;;  %s1746_s30 = smov 8  }
  0x73   : > { %s1747_s24 = smov 16   ;;  %p2132_p12 = scmp.ne.s32.totalorder %s2128_s8, 0 }
  0x74   : > { %1428 = vmatpush3.bf16.msra.mxu0 %v1427_v8 }
  0x75   : > { %1392 = vmatprep.subr.mxu0 %v1734_v1 }
  0x77   : > { %1370 = vmatmul.mubr.msk.f32.vlgmr.msra.gmra.mrb[0].mxu0 %vm322_vm1, %v324_v9 }
  0x78   : > { %1394 = vmatprep.mubr.msk.f32.mxu0 %vm1733_vm0, %v1734_v1 }
 0x14a   : > { %v406_v11 = vpop.f32.mrb[0].mxu0 }
 0x14b   : > { %v1997_v12 = vadd.f32 %v1316_v10, %v406_v11  ;;  %v1371_v13 = vpop.f32.mrb[1].mxu0  ;;  %v1090_v10 = vld [vmem:[#allocation8] sm:$0xff]  ;;  %v1091_v11 = vld [vmem:[#allocation8 + $0x8] sm:$0xff] }
 0x14c   : > { %v1092_v13 = vld [vmem:[#allocation8 + $0x10] sm:$0xff] }
 0x14d   : > { %501 = vrot.lane.b32.xlu1 %v1997_v12, %s1735_s7  ;;  %412 = vrot.lane.b32.xlu0 %v1997_v12, %s1736_s9  ;;  %v410_v14 = vmul.f32 0.35355338, %v1997_v12  ;;  %s1748_s7 = smov 24   ;;  %s1332_s9 = sshll.u32 %s1717_s21, 7 }
 0x14e   : > { %s1749_s21 = smov [#allocation9]  }
 0x151   : > { %579 = vrot.lane.b32.xlu1 %v1997_v12, %s1737_s11  ;;  %s307_s11 = scalar_lea.vmem [#allocation9], %s1311_s25  ;;  %s1643_s25 = sshll.u32 %s1749_s21, 4  ;;  %s1644_s25 = int_to_ptr.vmem [resolvable:$false] %s1643_s25 }
 0x155   : > { %577 = vrot.lane.b32.xlu1 %v410_v14, %s1738_s15  ;;  %s1188_s15 = sshll.u32 %s307_s11, 4  ;;  %s2064_s15 = int_to_ptr.vmem [resolvable:$true] %s1188_s15 }
 0x156   : > { %p1646_p3 = scmp.lt.s32.totalorder %s2064_s15, %s1644_s25 }
 0x159   : > { %744 = vrot.lane.b32.xlu1 %v1997_v12, %s1739_s27 }
 0x1bf   : > { %v502_v15 = vpop.permute.xlu1 %501  ;;  %v413_v16 = vpop.permute.xlu0 %412 }
 0x1c0   : > { %1373 = vmatpush3.xpose.msk.msra.mxu1 %vm414_vm2, %v413_v16 }
 0x1c1   : > { %1377 = vmatprep.subr.mxu1 %v1734_v1 }
 0x1c3   : > { %v580_v17 = vpop.permute.xlu1 %579  ;;  %1375 = vmatmul.mubr.msk.f32.vlgmr.msra.gmra.mrb[0].mxu1 %vm414_vm2, %v410_v14 }
 0x1c4   : > { %1378 = vmatpush3.msra.mxu1 %v502_v15  ;;  %1379 = vmatprep.mubr.msk.f32.mxu1 %vm1733_vm0, %v1734_v1 }
 0x1c5   : > { %1382 = vmatprep.subr.mxu1 %v1734_v1 }
 0x1c7   : > { %v578_v18 = vpop.permute.xlu1 %577 }
 0x1cb   : > { %v745_v19 = vpop.permute.xlu1 %744 }
 0x1cc   : > { %1393 = vmatpush3.xpose.msk.msra.mxu0 %vm414_vm2, %v745_v19 }
 0x1cd   : > { %1402 = vmatprep.subr.mxu0 %v1734_v1 }
 0x296   : > { %v486_v20 = vpop.f32.mrb[0].mxu1 }
 0x297   : > { %v1376_v21 = vpop.f32.mrb[1].mxu1  ;;  %v490_v22 = vsel %vm414_vm2, %v486_v20, -inf }
 0x298   : > { %491 = vmax.xlane.f32.xlu0 %v490_v22 }
 0x2ae   : > { %909 = vrot.lane.b32.xlu0 %v1997_v12, %s1740_s14 }
 0x325   : > { %v492_v23 = vpop.xlane.xlu0 %491 }
 0x326   : > { %v493_v24 = vsub.f32 %v486_v20, %v492_v23 }
 0x328   : > { %v494_v25 = vmul.f32 1.442695, %v493_v24 }
 0x329   : > { %v910_v30 = vpop.permute.xlu0 %909 }
 0x32a   : > { %1537 = vpow2.f32 %v494_v25 }
 0x334   : > { %v1538_v26 = vpop.eup %1537 }
 0x335   : > { %v496_v27 = vsel %vm414_vm2, %v1538_v26, 0.0 }
 0x336   : > { %497 = vadd.xlane.f32.xlu1 %v496_v27 }
 0x347   : > { %742 = vrot.lane.b32.xlu1 %v410_v14, %s1741_s10  ;;  %s2062_s10 = scalar_lea.hbm %s2117_s5, %s1332_s9 }
 0x34b   : > { %907 = vrot.lane.b32.xlu1 %v410_v14, %s1742_s16  ;;  %v1093_v14 = vld [vmem:[#allocation8 + $0x18] sm:$0xff]  ;;  %s1175_s16 = scalar_lea.sflag [#allocation5], %s1965_s13 }
 0x34c   : > { %v1433_v15 = vpack.c.bf16 %v1093_v14, %v1092_v13 }
 0x3c3   : > { %v498_v28 = vpop.xlane.xlu1 %497 }
 0x3c4   : > { %1539 = vrcp.f32 %v498_v28 }
 0x3c7   : > { %v743_v29 = vpop.permute.xlu1 %742 }
 0x3c8   : > { %1395 = vmatmul.mubr.msk.f32.vlgmr.msra.gmra.mrb[2].mxu0 %vm414_vm2, %v743_v29 }
 0x3c9   : > { %1403 = vmatpush3.xpose.msk.msra.mxu0 %vm414_vm2, %v910_v30  ;;  %1404 = vmatprep.mubr.msk.f32.mxu0 %vm1733_vm0, %v1734_v1 }
 0x3ca   : > { %1429 = vmatprep.subr.bf16.mxu0 %v1732_v0 }
 0x3cb   : > { %v908_v31 = vpop.permute.xlu1 %907 }
 0x3cc   : > { %1405 = vmatmul.mubr.msk.f32.vlgmr.msra.gmra.mrb[4].mxu0 %vm414_vm2, %v908_v31 }
 0x3cd   : > { %1420 = vmatprep.mubr.msk.f32.mxu0 %vm1733_vm0, %v1734_v1 }
 0x3ce   : > { %v1540_v32 = vpop.eup %1539 }
 0x3cf   : > { %v500_v33 = vmul.f32 %v1540_v32, %v1538_v26  ;;  %v1089_v26 = vld [vmem:[#allocation2] sm:$0xff] }
 0x3d1   : > { %1380 = vmatmul.mubr.msk.f32.vlgmr.msra.gmra.mrb[2].mxu1 %vm414_vm2, %v500_v33 }
 0x3d2   : > { %1383 = vmatpush3.xpose.msk.msra.mxu1 %vm414_vm2, %v580_v17  ;;  %1384 = vmatprep.mubr.msk.f32.mxu1 %vm1733_vm0, %v1734_v1 }
 0x3d3   : > { %1387 = vmatprep.subr.mxu1 %v1734_v1 }
 0x3d5   : > { %1385 = vmatmul.mubr.msk.f32.vlgmr.msra.gmra.mrb[4].mxu1 %vm414_vm2, %v578_v18 }
 0x3d6   : > { %1389 = vmatprep.mubr.msk.f32.mxu1 %vm1733_vm0, %v1734_v1 }
 0x49b   : > { %v816_v34 = vpop.f32.mrb[2].mxu0 }
 0x49c   : > { %v1396_v35 = vpop.f32.mrb[3].mxu0  ;;  %v820_v36 = vsel %vm414_vm2, %v816_v34, -inf }
 0x49d   : > { %821 = vmax.xlane.f32.xlu0 %v820_v36 }
 0x49f   : > { %v981_v37 = vpop.f32.mrb[4].mxu0 }
 0x4a0   : > { %v1406_v38 = vpop.f32.mrb[5].mxu0  ;;  %v985_v44 = vsel %vm414_vm2, %v981_v37, -inf }
 0x4a4   : > { %v2032_v39 = vpop.f32.mrb[2].mxu1 }
 0x4a5   : > { %v1381_v40 = vpop.f32.mrb[3].mxu1 }
 0x4a8   : > { %v651_v41 = vpop.f32.mrb[4].mxu1 }
 0x4a9   : > { %v1386_v42 = vpop.f32.mrb[5].mxu1  ;;  %v655_v43 = vsel %vm414_vm2, %v651_v41, -inf }
 0x4aa   : > { %656 = vmax.xlane.f32.xlu1 %v655_v43 }
 0x4ae   : > { %986 = vmax.xlane.f32.xlu1 %v985_v44 }
 0x52a   : > { %v822_v45 = vpop.xlane.xlu0 %821 }
 0x52b   : > { %v823_v46 = vsub.f32 %v816_v34, %v822_v45 }
 0x52d   : > { %v824_v47 = vmul.f32 1.442695, %v823_v46 }
 0x52f   : > { %1541 = vpow2.f32 %v824_v47 }
 0x537   : > { %v657_v48 = vpop.xlane.xlu1 %656 }
 0x538   : > { %v658_v56 = vsub.f32 %v651_v41, %v657_v48 }
 0x539   : > { %v1542_v49 = vpop.eup %1541 }
 0x53a   : > { %v826_v50 = vsel %vm414_vm2, %v1542_v49, 0.0  ;;  %v659_v57 = vmul.f32 1.442695, %v658_v56 }
 0x53b   : > { %827 = vadd.xlane.f32.xlu1 %v826_v50  ;;  %v987_v51 = vpop.xlane.xlu1 %986 }
 0x53c   : > { %v988_v52 = vsub.f32 %v981_v37, %v987_v51 }
 0x53e   : > { %v989_v53 = vmul.f32 1.442695, %v988_v52 }
 0x540   : > { %1543 = vpow2.f32 %v989_v53 }
 0x541   : > { %1545 = vpow2.f32 %v659_v57 }
 0x54a   : > { %v1544_v54 = vpop.eup %1543 }
 0x54b   : > { %v991_v55 = vsel %vm414_vm2, %v1544_v54, 0.0  ;;  %v1546_v58 = vpop.eup %1545 }
 0x54c   : > { %666 = vrot.lane.b32.xlu1 %v1997_v12, %s1743_s17  ;;  %992 = vadd.xlane.f32.xlu0 %v991_v55  ;;  %v661_v59 = vsel %vm414_vm2, %v1546_v58, 0.0  ;;  %s1639_s17 = scalar_lea.vmem %s2064_s15, 128 }
 0x54d   : > { %p1640_p8 = scmp.ne.s32.totalorder %s2064_s15, %s1639_s17 }
 0x54f   : > { %p1641_p1 = pnand %p1640_p8, %p2132_p12 }
 0x551   : > { %p1642_p10 = pneg %p1641_p1 }
 0x562   : > { %831 = vrot.lane.b32.xlu0 %v1997_v12, %s1744_s26  ;;  %s1645_s26 = scalar_lea.vmem %s1644_s25, 256 }
 0x563   : > { %p1647_p5 = scmp.lt.s32.totalorder %s1645_s26, %s1639_s17 }
 0x565   : > { %p1648_p9 = por %p1647_p5, %p1646_p3 }
 0x567   : > { %p1649_p11 = pnand %p1648_p9, %p1642_p10 }
 0x570   : > { %662 = vadd.xlane.f32.xlu1 %v661_v59 }
 0x581   : > { %996 = vrot.lane.b32.xlu1 %v1997_v12, %s1745_s28  ;;  %v1430_v12 = vpack.c.bf16 %v1091_v11, %v1090_v10 }
 0x583   : > { %1431 = vmatpush3.bf16.msra.mxu0 %v1430_v12 }
 0x584   : > { %1432 = vmatprep.subr.bf16.mxu0 %v1732_v0 }
 0x587   : > { %1434 = vmatpush3.bf16.msra.mxu0 %v1433_v15 }
 0x5c8   : > { %v828_v60 = vpop.xlane.xlu1 %827 }
 0x5cc   : > { %v667_v61 = vpop.permute.xlu1 %666 }
 0x5cd   : > { %1388 = vmatpush3.msra.mxu1 %v667_v61 }
 0x5ce   : > { %1397 = vmatprep.subr.mxu1 %v1734_v1 }
 0x5d9   : > { %v993_v63 = vpop.xlane.xlu0 %992 }
 0x5dd   : > { %v832_v5 = vpop.permute.xlu0 %831 }
 0x5fd   : > { %v663_v62 = vpop.xlane.xlu1 %662 }
 0x5fe   : > { %1547 = vrcp.f32 %v663_v62 }
 0x5ff   : > { %1549 = vrcp.f32 %v828_v60 }
 0x600   : > { %1551 = vrcp.f32 %v993_v63 }
 0x601   : > { %v997_v8 = vpop.permute.xlu1 %996 }
 0x608   : > { %v1548_v2 = vpop.eup %1547 }
 0x609   : > { %v665_v3 = vmul.f32 %v1548_v2, %v1546_v58  ;;  %v1550_v4 = vpop.eup %1549 }
 0x60a   : > { %v830_v6 = vmul.f32 %v1550_v4, %v1542_v49  ;;  %v1552_v7 = vpop.eup %1551 }
 0x60b   : > { %1390 = vmatmul.mubr.msk.f32.vlgmr.msra.gmra.mrb[6].mxu1 %vm414_vm2, %v665_v3  ;;  %v995_v9 = vmul.f32 %v1552_v7, %v1544_v54 }
 0x60c   : > { %1398 = vmatpush3.msra.mxu1 %v832_v5  ;;  %1399 = vmatprep.mubr.msk.f32.mxu1 %vm1733_vm0, %v1734_v1 }
 0x60d   : > { %1407 = vmatprep.subr.mxu1 %v1734_v1 }
 0x60f   : > { %1400 = vmatmul.mubr.msk.f32.vlgmr.msra.gmra.mrb[8].mxu1 %vm414_vm2, %v830_v6 }
 0x610   : > { %1408 = vmatpush3.msra.mxu1 %v997_v8  ;;  %1409 = vmatprep.mubr.msk.f32.mxu1 %vm1733_vm0, %v1734_v1 }
 0x613   : > { %1410 = vmatmul.mubr.msk.f32.vlgmr.msra.gmra.mrb[10].mxu1 %vm414_vm2, %v995_v9 }
 0x6de   : > { %v738_v16 = vpop.f32.mrb[6].mxu1 }
 0x6df   : > { %1073 = vrot.lane.b32.xlu1 %v738_v16, %s1746_s30  ;;  %v1391_v17 = vpop.f32.mrb[7].mxu1 }
 0x6e2   : > { %v903_v18 = vpop.f32.mrb[8].mxu1 }
 0x6e3   : > { %1077 = vrot.lane.b32.xlu0 %v903_v18, %s1747_s24  ;;  %v1401_v1 = vpop.f32.mrb[9].mxu1 }
 0x6e6   : > { %v1068_v19 = vpop.f32.mrb[10].mxu1 }
 0x6e7   : > { %1081 = vrot.lane.b32.xlu1 %v1068_v19, %s1748_s7  ;;  %v1411_v20 = vpop.f32.mrb[11].mxu1 }
 0x751   : > { %v1074_v21 = vpop.permute.xlu1 %1073 }
 0x752   : > { %v1084_v22 = vsel %vm414_vm2, %v2032_v39, %v1074_v21 }
 0x755   : > { %v1078_v0 = vpop.permute.xlu0 %1077 }
 0x756   : > { %v1086_v23 = vsel %vm1085_vm3, %v1084_v22, %v1078_v0 }
 0x759   : > { %v1082_v24 = vpop.permute.xlu1 %1081 }
 0x75a   : > { %v1088_v25 = vsel %vm1087_vm4, %v1086_v23, %v1082_v24 }
 0x75b   : > { %1421 = vmatmul.mubr.msk.f32.vlgmr.msra.gmra.mrb[6].mxu0 %vm322_vm1, %v1088_v25 }
 0x82e   : > { %v1163_v27 = vpop.f32.mrb[6].mxu0 }
 0x82f   : > { %v1167_v28 = vadd.f32 %v1163_v27, %v1089_v26  ;;  %v1422_v29 = vpop.f32.mrb[7].mxu0 }
 0x831   : > { %1168 = vst.msk [vmem:[#allocation2] sm:$0xff] %vm322_vm1, %v1167_v28 }
 0x838   : > { %v1172_v30 = vld [vmem:[#allocation2] sm:$0xff] }
 0x839   : > { %1173 = vst.msk [vmem:[%s307_s11] sm:$0xff] %vm322_vm1, %v1172_v30 }
 0x83a   : > { %1652 = shalt.err (!%p1649_p11)
}
 0x83b   : > { %s1653_s13 = scalar_lea.hbm %s2062_s10, 128  ;;  %s1657_s24 = scalar_lea.hbm %s2117_s5, 256 }
 0x83c   : > { %p1654_p0 = scmp.ne.s32.totalorder %s2062_s10, %s1653_s13  ;;  %p1658_p6 = scmp.lt.u32.totalorder %s2062_s10, %s2117_s5 }
 0x83d   : > { %p1659_p7 = scmp.lt.u32.totalorder %s1657_s24, %s1653_s13  ;;  %p1661_p8 = scmp.lt.u32.totalorder %s1653_s13, %s2062_s10 }
 0x83e   : > { %p1655_p4 = pnand %p1654_p0, %p2132_p12 }
 0x83f   : > { %p1660_p2 = por %p1659_p7, %p1658_p6 }
 0x840   : > { %p1656_p13 = pneg %p1655_p4 }
 0x841   : > { %p1662_p1 = por %p1661_p8, %p1660_p2 }
 0x843   : > { %p1663_p10 = pnand %p1662_p1, %p1656_p13 }
 0x845   : > { %1666 = shalt.err (!%p1663_p10)
}
 0x846   : > { %1445 = dma.vmem_to_hbm [thread:$0]  (%p2132_p12), %s2064_s15, 128, %s2062_s10, %s1175_s16  }
 0x847 PF: > { %s1200_s11 = sand.u32 1, %s1705_s18   ;;  %p2133_p3 = scmp.ne.s32.totalorder %s2125_s29, 0 }
 0x848   : > { %p2134_p5 = scmp.ge.s32.totalorder %s1725_s23, 2  ;;  %s1201_s27 = scalar_lea.sflag [#allocation5], %s1200_s11 }
 0x84a   : > { %p1459_p9 = pnand %p2134_p5, %p2133_p3 }
 0x84c   : > { %1700 = dma.done.wait (!%p1459_p9), %s1201_s27, 128  }
 0x84d   : > { %1702 = vsyncadd (!%p1459_p9), %s1201_s27, 4294967168  ;;  %s22_s23 = sadd.s32 1, %s1725_s23   ;;  %s2135_s18 = smov %s1709_s19 }
 0x84e   : > { %p19_p11 = scmp.ge.s32.totalorder %s22_s23, 4   ;;  %s2136_s19 = smov %s1713_s20 }
 0x84f   : > { %s2137_s20 = smov %s1922_s6  ;;  %s2138_s21 = smov %s1721_s22 }
 0x850   : > { %s2139_s22 = smov %s2141_s12  ;;  %21 = sbr.rel (!%p19_p11) target bundleno = 7 (0x7), region = 106 }
 0x857   :  { %1206 = vsyncpa [#allocation4], 1 }
 0x858   :  { %1208 = vsyncpa [#allocation4 + $0x1], 1 }
 0x859   :  { %1209 = vsyncpa [#allocation7], 1 }
 0x85a   :  { %1210 = vsyncpa [#allocation5], 1 }
 0x85b   :  { %1212 = vsyncpa [#allocation5 + $0x1], 1 }

</bundles_post_ra>
